<compile_context>
chip_gen: v5e
topology: v5e:2x2
jax: 0.10.0
libtpu: 0.0.40
codegen_flags: <defaults>
</compile_context>

<pallas_src>
import functools

import jax
import jax.numpy as jnp
from jax.experimental import pallas as pl
from jax.experimental.pallas import tpu as pltpu


def _mlp_kernel(x_ref, w1_ref, b1_ref, w2_ref, b2_ref, o_ref):
    # Hidden layer: h = relu(x @ W1 + b1), accumulated in f32 on the MXU.
    h = jnp.dot(x_ref[...], w1_ref[...], preferred_element_type=jnp.float32)
    h = jnp.maximum(h + b1_ref[...], 0.0)           # b1 is [1, H_p] -> broadcast
    # Output layer: y = h @ W2 + b2. Cast h back to the MXU compute dtype so
    # the second matmul also runs at native (bf16) MXU throughput.
    h = h.astype(w2_ref.dtype)
    y = jnp.dot(h, w2_ref[...], preferred_element_type=jnp.float32)
    o_ref[...] = (y + b2_ref[...]).astype(o_ref.dtype)


def _round_up(v, m):
    return (v + m - 1) // m * m


@functools.partial(jax.jit, static_argnames=("compute_dtype", "tm"))
def mlp_forward(x, w1, b1, w2, b2, *, compute_dtype=jnp.bfloat16, tm=None):
    """x: [B, D_in], w1: [D_in, H], b1: [H], w2: [H, D_out], b2: [D_out]."""
    B, D_in = x.shape
    H = w1.shape[1]
    D_out = w2.shape[1]

    # Lane-dense padded feature dims (multiples of 128 = vreg lane width).
    D_in_p = _round_up(D_in, 128)
    H_p = _round_up(H, 128)
    D_out_p = _round_up(D_out, 128)

    # Batch tile: >=256 rows per grid step when batch is large (fills the
    # v6e/v7x 256x256 MXU arrays); otherwise a single sublane-aligned tile.
    if tm is None:
        tm = 256 if B >= 256 else _round_up(B, 8)
    B_p = _round_up(B, tm)

    cdt = jnp.dtype(compute_dtype)

    # Zero-pad and cast. Zero-padded weight columns / bias entries guarantee
    # the padded hidden/output lanes are exactly 0 (relu(0 + 0) = 0), so the
    # final slice recovers the unpadded result bit-for-bit.
    xp = jnp.zeros((B_p, D_in_p), cdt).at[:B, :D_in].set(x.astype(cdt))
    w1p = jnp.zeros((D_in_p, H_p), cdt).at[:D_in, :H].set(w1.astype(cdt))
    b1p = jnp.zeros((1, H_p), jnp.float32).at[0, :H].set(b1.astype(jnp.float32))
    w2p = jnp.zeros((H_p, D_out_p), cdt).at[:H, :D_out].set(w2.astype(cdt))
    b2p = jnp.zeros((1, D_out_p), jnp.float32).at[0, :D_out].set(b2.astype(jnp.float32))

    grid = (B_p // tm,)

    # VMEM budget: double-buffered x/out tiles + resident weights/biases +
    # f32 hidden intermediate, with 2x headroom; capped below v7x's 64 MiB.
    out_size = jnp.dtype(x.dtype).itemsize
    tile_bytes = tm * D_in_p * cdt.itemsize + tm * D_out_p * out_size
    weight_bytes = (D_in_p * H_p + H_p * D_out_p) * cdt.itemsize \
        + 8 * (H_p + D_out_p) * 4
    hidden_bytes = tm * H_p * 4
    est = 2 * (tile_bytes + weight_bytes) + hidden_bytes
    vmem_limit = int(min(48 << 20, max(16 << 20, 2 * est)))

    out_padded = pl.pallas_call(
        _mlp_kernel,
        out_shape=jax.ShapeDtypeStruct((B_p, D_out_p), x.dtype),
        grid=grid,
        in_specs=[
            # x: tiled over the batch axis.
            pl.BlockSpec((tm, D_in_p), lambda i: (i, 0)),
            # Weights / biases: constant index_map -> VMEM-resident, DMA'd once.
            pl.BlockSpec((D_in_p, H_p), lambda i: (0, 0)),
            pl.BlockSpec((1, H_p), lambda i: (0, 0)),
            pl.BlockSpec((H_p, D_out_p), lambda i: (0, 0)),
            pl.BlockSpec((1, D_out_p), lambda i: (0, 0)),
        ],
        out_specs=pl.BlockSpec((tm, D_out_p), lambda i: (i, 0)),
        compiler_params=pltpu.CompilerParams(
            dimension_semantics=("parallel",),
            vmem_limit_bytes=vmem_limit,
        ),
    )(xp, w1p, b1p, w2p, b2p)

    return out_padded[:B, :D_out]


def init_params(key, input_dim, hidden_dim, output_dim):
    """Deterministic init matching nn.Linear's U(-1/sqrt(fan_in), +1/sqrt(fan_in))."""
    k1, k2, k3, k4 = jax.random.split(key, 4)
    bound1 = 1.0 / (input_dim ** 0.5)
    bound2 = 1.0 / (hidden_dim ** 0.5)
    # Stored pre-transposed: [in_features, out_features]
    w1 = jax.random.uniform(k1, (input_dim, hidden_dim), jnp.float32, -bound1, bound1)
    b1 = jax.random.uniform(k2, (hidden_dim,), jnp.float32, -bound1, bound1)
    w2 = jax.random.uniform(k3, (hidden_dim, output_dim), jnp.float32, -bound2, bound2)
    b2 = jax.random.uniform(k4, (output_dim,), jnp.float32, -bound2, bound2)
    return w1, b1, w2, b2


if __name__ == "__main__":
    batch, input_dim, hidden_dim, output_dim = 8, 32, 64, 16

    key = jax.random.PRNGKey(0)
    kx, kp = jax.random.split(key)
    x = jax.random.normal(kx, (batch, input_dim), jnp.float32)
    w1, b1, w2, b2 = init_params(kp, input_dim, hidden_dim, output_dim)

    # Pure-JAX reference of the PyTorch forward: relu(x @ W1 + b1) @ W2 + b2.
    ref = jnp.maximum(x @ w1 + b1, 0.0) @ w2 + b2

    # Exact-precision path (f32 MXU operands): must match the reference tightly.
    out_f32 = mlp_forward(x, w1, b1, w2, b2, compute_dtype=jnp.float32)
    jax.block_until_ready(out_f32)
    assert out_f32.shape == (batch, output_dim)
    assert jnp.allclose(out_f32, ref, atol=1e-5, rtol=1e-5)

    # Fast path (bf16 MXU operands, f32 accumulation): small quantization error.
    out_bf16 = mlp_forward(x, w1, b1, w2, b2, compute_dtype=jnp.bfloat16)
    jax.block_until_ready(out_bf16)
    assert out_bf16.shape == (batch, output_dim)
    assert jnp.allclose(out_bf16, ref, atol=2e-2, rtol=2e-2)

    print("KERNEL_OK")
</pallas_src>

<mosaic_0001>
module attributes {stable_mosaic.version = 11 : i64} {
  func.func @_mlp_kernel(%arg0: i32, %arg1: memref<8x128xf32, #tpu.memory_space<vmem>>, %arg2: memref<128x128xf32, #tpu.memory_space<vmem>>, %arg3: memref<1x128xf32, #tpu.memory_space<vmem>>, %arg4: memref<128x128xf32, #tpu.memory_space<vmem>>, %arg5: memref<1x128xf32, #tpu.memory_space<vmem>>, %arg6: memref<8x128xf32, #tpu.memory_space<vmem>>) attributes {dimension_semantics = [#tpu.dimension_semantics<parallel>], iteration_bounds = array<i64: 1>, scalar_prefetch = 0 : i64, scratch_operands = 0 : i64, tpu.core_type = #tpu.core_type<tc>, window_params = [{transform_indices = @transform_0, window_bounds = array<i64: 8, 128>}, {pipeline_mode = #tpu.pipeline_mode<synchronous>, transform_indices = @transform_1, window_bounds = array<i64: 128, 128>}, {pipeline_mode = #tpu.pipeline_mode<synchronous>, transform_indices = @transform_2, window_bounds = array<i64: 1, 128>}, {pipeline_mode = #tpu.pipeline_mode<synchronous>, transform_indices = @transform_3, window_bounds = array<i64: 128, 128>}, {pipeline_mode = #tpu.pipeline_mode<synchronous>, transform_indices = @transform_4, window_bounds = array<i64: 1, 128>}, {transform_indices = @transform_5, window_bounds = array<i64: 8, 128>}]} {
    %c0 = arith.constant 0 : index
    %c0_0 = arith.constant 0 : index
    %0 = vector.load %arg1[%c0, %c0_0] : memref<8x128xf32, #tpu.memory_space<vmem>>, vector<8x128xf32>
    %c0_1 = arith.constant 0 : index
    %c0_2 = arith.constant 0 : index
    %1 = vector.load %arg2[%c0_1, %c0_2] : memref<128x128xf32, #tpu.memory_space<vmem>>, vector<128x128xf32>
    %cst = arith.constant dense<0.000000e+00> : vector<8x128xf32>
    %2 = tpu.matmul %0, %1, %cst {dimension_numbers = #tpu.dot_dimension_numbers<[1], [0], [0], [1], [0, 0, 1, 1], [], []>} : vector<8x128xf32>, vector<128x128xf32>, vector<8x128xf32> -> vector<8x128xf32>
    %c0_3 = arith.constant 0 : index
    %c0_4 = arith.constant 0 : index
    %3 = vector.load %arg3[%c0_3, %c0_4] : memref<1x128xf32, #tpu.memory_space<vmem>>, vector<1x128xf32>
    %4 = vector.broadcast %3 : vector<1x128xf32> to vector<8x128xf32>
    %5 = arith.addf %2, %4 : vector<8x128xf32>
    %cst_5 = arith.constant 0.000000e+00 : f32
    %6 = vector.broadcast %cst_5 : f32 to vector<8x128xf32>
    %7 = arith.maximumf %5, %6 : vector<8x128xf32>
    %c0_6 = arith.constant 0 : index
    %c0_7 = arith.constant 0 : index
    %8 = vector.load %arg4[%c0_6, %c0_7] : memref<128x128xf32, #tpu.memory_space<vmem>>, vector<128x128xf32>
    %cst_8 = arith.constant dense<0.000000e+00> : vector<8x128xf32>
    %9 = tpu.matmul %7, %8, %cst_8 {dimension_numbers = #tpu.dot_dimension_numbers<[1], [0], [0], [1], [0, 0, 1, 1], [], []>} : vector<8x128xf32>, vector<128x128xf32>, vector<8x128xf32> -> vector<8x128xf32>
    %c0_9 = arith.constant 0 : index
    %c0_10 = arith.constant 0 : index
    %10 = vector.load %arg5[%c0_9, %c0_10] : memref<1x128xf32, #tpu.memory_space<vmem>>, vector<1x128xf32>
    %11 = vector.broadcast %10 : vector<1x128xf32> to vector<8x128xf32>
    %12 = arith.addf %9, %11 : vector<8x128xf32>
    %c0_11 = arith.constant 0 : index
    %c0_12 = arith.constant 0 : index
    %13 = vector.load %arg6[%c0_11, %c0_12] : memref<8x128xf32, #tpu.memory_space<vmem>>, vector<8x128xf32>
    tpu.vector_store %arg6[%c0_11, %c0_12], %12 {strides = array<i32>} : memref<8x128xf32, #tpu.memory_space<vmem>>, vector<8x128xf32>,
    return
  }
  func.func @transform_0(%arg0: i32) -> (i32, i32) {
    %c0_i32 = arith.constant 0 : i32
    %c0_i32_0 = arith.constant 0 : i32
    return %arg0, %c0_i32 : i32, i32
  }
  func.func @transform_1(%arg0: i32) -> (i32, i32) {
    %c0_i32 = arith.constant 0 : i32
    %c0_i32_0 = arith.constant 0 : i32
    %c0_i32_1 = arith.constant 0 : i32
    return %c0_i32, %c0_i32_0 : i32, i32
  }
  func.func @transform_2(%arg0: i32) -> (i32, i32) {
    %c0_i32 = arith.constant 0 : i32
    %c0_i32_0 = arith.constant 0 : i32
    %c0_i32_1 = arith.constant 0 : i32
    return %c0_i32, %c0_i32_0 : i32, i32
  }
  func.func @transform_3(%arg0: i32) -> (i32, i32) {
    %c0_i32 = arith.constant 0 : i32
    %c0_i32_0 = arith.constant 0 : i32
    %c0_i32_1 = arith.constant 0 : i32
    return %c0_i32, %c0_i32_0 : i32, i32
  }
  func.func @transform_4(%arg0: i32) -> (i32, i32) {
    %c0_i32 = arith.constant 0 : i32
    %c0_i32_0 = arith.constant 0 : i32
    %c0_i32_1 = arith.constant 0 : i32
    return %c0_i32, %c0_i32_0 : i32, i32
  }
  func.func @transform_5(%arg0: i32) -> (i32, i32) {
    %c0_i32 = arith.constant 0 : i32
    %c0_i32_0 = arith.constant 0 : i32
    return %arg0, %c0_i32 : i32, i32
  }
}

</mosaic_0001>

<bundles_post_ra>
// kernel: mlp_forward.1
= control target key start
LH: loop header
LB: loop body
LE: loop exit
PB: predicated region body
PF: predicated region fallthrough
CT: control target
= control target key end

     0   :  { %s288_s0 = inlined_call_operand.vmem [shape: f32[8,128], index: 0, kind: input, shape index: {}]   ;;  %s289_s1 = inlined_call_operand.vmem [shape: f32[128,128], index: 1, kind: input, shape index: {}]   ;;  %s290_s2 = inlined_call_operand.vmem [shape: f32[1,128], index: 2, kind: input, shape index: {}]   ;;  %s291_s3 = inlined_call_operand.vmem [shape: f32[128,128], index: 3, kind: input, shape index: {}]   ;;  %s292_s4 = inlined_call_operand.vmem [shape: f32[1,128], index: 4, kind: input, shape index: {}]   ;;  %s293_s5 = inlined_call_operand.hbm [shape: f32[8,128], index: 5, kind: output, shape index: {}]  }
   0x1   :  { %v37_v0 = vld [vmem:[%s289_s1 + $0x78] sm:$0xff]  ;;  %v36_v1 = vld [vmem:[%s289_s1 + $0x70] sm:$0xff]  ;;  %v35_v2 = vld [vmem:[%s289_s1 + $0x68] sm:$0xff] }
   0x2   :  { %42 = vmatpush.msra.mxu0 %v37_v0  ;;  %v34_v3 = vld [vmem:[%s289_s1 + $0x60] sm:$0xff]  ;;  %v78_v4 = vld [vmem:[%s291_s3 + $0x78] sm:$0xff]  ;;  %v77_v6 = vld [vmem:[%s291_s3 + $0x70] sm:$0xff] }
   0x3   :  { %v33_v5 = vld [vmem:[%s289_s1 + $0x58] sm:$0xff]  ;;  %83 = vmatpush.msra.mxu1 %v78_v4  ;;  %v76_v7 = vld [vmem:[%s291_s3 + $0x68] sm:$0xff]  ;;  %v32_v8 = vld [vmem:[%s289_s1 + $0x50] sm:$0xff] }
   0x4   :  { %43 = vmatpush.msra.mxu0 %v36_v1  ;;  %v75_v9 = vld [vmem:[%s291_s3 + $0x60] sm:$0xff]  ;;  %v31_v10 = vld [vmem:[%s289_s1 + $0x48] sm:$0xff]  ;;  %v74_v11 = vld [vmem:[%s291_s3 + $0x58] sm:$0xff] }
   0x5   :  { %84 = vmatpush.msra.mxu1 %v77_v6 }
   0x6   :  { %44 = vmatpush.msra.mxu0 %v35_v2 }
   0x7   :  { %85 = vmatpush.msra.mxu1 %v76_v7 }
   0x8   :  { %45 = vmatpush.msra.mxu0 %v34_v3 }
   0xa   :  { %46 = vmatpush.msra.mxu0 %v33_v5 }
   0xc   :  { %47 = vmatpush.msra.mxu0 %v32_v8 }
   0xd   :  { %10 = vsyncpa [#allocation3], 0  ;;  %v30_v12 = vld [vmem:[%s289_s1 + $0x40] sm:$0xff]  ;;  %86 = vmatpush.msra.mxu1 %v75_v9  ;;  %v73_v13 = vld [vmem:[%s291_s3 + $0x50] sm:$0xff]  ;;  %s149_s11 = smov [#allocation2]   ;;  %s111_s15 = sshll.u32 %s293_s5, 4  ;;  %s112_s15 = int_to_ptr.hbm [resolvable:$true] %s111_s15 }
   0xe   :  { %48 = vmatpush.msra.mxu0 %v31_v10  ;;  %v29_v14 = vld [vmem:[%s289_s1 + $0x38] sm:$0xff]  ;;  %v72_v15 = vld [vmem:[%s291_s3 + $0x48] sm:$0xff]  ;;  %v28_v16 = vld [vmem:[%s289_s1 + $0x30] sm:$0xff]  ;;  %s109_s12 = sshll.u32 %s149_s11, 4  ;;  %s110_s12 = int_to_ptr.vmem [resolvable:$true] %s109_s12 }
   0xf   :  { %87 = vmatpush.msra.mxu1 %v74_v11  ;;  %v71_v17 = vld [vmem:[%s291_s3 + $0x40] sm:$0xff]  ;;  %v27_v18 = vld [vmem:[%s289_s1 + $0x28] sm:$0xff]  ;;  %v70_v19 = vld [vmem:[%s291_s3 + $0x38] sm:$0xff] }
  0x10   :  { %49 = vmatpush.msra.mxu0 %v30_v12  ;;  %v26_v20 = vld [vmem:[%s289_s1 + $0x20] sm:$0xff]  ;;  %v69_v21 = vld [vmem:[%s291_s3 + $0x30] sm:$0xff]  ;;  %v25_v22 = vld [vmem:[%s289_s1 + $0x18] sm:$0xff] }
  0x11   :  { %88 = vmatpush.msra.mxu1 %v73_v13  ;;  %v68_v23 = vld [vmem:[%s291_s3 + $0x28] sm:$0xff]  ;;  %v24_v24 = vld [vmem:[%s289_s1 + $0x10] sm:$0xff]  ;;  %v67_v25 = vld [vmem:[%s291_s3 + $0x20] sm:$0xff] }
  0x12   :  { %50 = vmatpush.msra.mxu0 %v29_v14  ;;  %v23_v26 = vld [vmem:[%s289_s1 + $0x8] sm:$0xff]  ;;  %v66_v27 = vld [vmem:[%s291_s3 + $0x18] sm:$0xff]  ;;  %v22_v28 = vld [vmem:[%s289_s1] sm:$0xff] }
  0x13   :  { %89 = vmatpush.msra.mxu1 %v72_v15  ;;  %v21_v29 = vld [vmem:[%s288_s0] sm:$0xff]  ;;  %v65_v30 = vld [vmem:[%s291_s3 + $0x10] sm:$0xff]  ;;  %v64_v31 = vld [vmem:[%s291_s3 + $0x8] sm:$0xff] }
  0x14   :  { %51 = vmatpush.msra.mxu0 %v28_v16  ;;  %v63_v32 = vld [vmem:[%s291_s3] sm:$0xff] }
  0x15   :  { %90 = vmatpush.msra.mxu1 %v71_v17  ;;  %v121_v33 = vld [vmem:[%s290_s2] ss:$0 sm:$0xff] }
  0x16   :  { %52 = vmatpush.msra.mxu0 %v27_v18  ;;  %v122_v37 = vld [vmem:[%s292_s4] ss:$0 sm:$0xff] }
  0x17   :  { %91 = vmatpush.msra.mxu1 %v70_v19 }
  0x18   :  { %53 = vmatpush.msra.mxu0 %v26_v20 }
  0x19   :  { %92 = vmatpush.msra.mxu1 %v69_v21 }
  0x1a   :  { %54 = vmatpush.msra.mxu0 %v25_v22 }
  0x1b   :  { %93 = vmatpush.msra.mxu1 %v68_v23 }
  0x1c   :  { %55 = vmatpush.msra.mxu0 %v24_v24 }
  0x1d   :  { %94 = vmatpush.msra.mxu1 %v67_v25 }
  0x1e   :  { %56 = vmatpush.msra.mxu0 %v23_v26 }
  0x1f   :  { %95 = vmatpush.msra.mxu1 %v66_v27 }
  0x20   :  { %57 = vmatpush.msra.mxu0 %v22_v28 }
  0x21   :  { %58 = vmatmul.f32.vlgmr.msra.gmra.mxu0 %v21_v29  ;;  %96 = vmatpush.msra.mxu1 %v65_v30 }
  0x23   :  { %97 = vmatpush.msra.mxu1 %v64_v31 }
  0x25   :  { %98 = vmatpush.msra.mxu1 %v63_v32 }
  0x9e   :  { %v59_v34 = vpop.f32.mrf.mxu0 }
  0x9f   :  { %v60_v35 = vadd.f32 %v121_v33, %v59_v34 }
  0xa1   :  { %v62_v36 = vmax.f32 %v60_v35, 0.0 }
  0xa3   :  { %99 = vmatmul.f32.vlgmr.msra.gmra.mxu1 %v62_v36 }
 0x120   :  { %v100_v38 = vpop.f32.mrf.mxu1 }
 0x121   :  { %v101_v39 = vadd.f32 %v122_v37, %v100_v38 }
 0x123   :  { %103 = vst [vmem:[#allocation2] sm:$0xff] %v101_v39 }
 0x124   :  { %114 = dma.vmem_to_hbm [thread:$0]  %s110_s12, 128, %s112_s15, [#allocation3]  }
 0x125   :  { %147 = dma.done.wait [#allocation3], 128  }
 0x126   :  { %148 = vsyncadd [#allocation3], 4294967168 }
 0x127   :  { %119 = vsyncpa [#allocation3], 1 }

</bundles_post_ra>
